<compile_context>
chip_gen: v7x
topology: tpu7x:2x2x1
jax: 0.10.0
libtpu: 0.0.40
codegen_flags: <defaults>
</compile_context>

<pallas_src>
import functools

import jax
import jax.numpy as jnp
from jax import lax
from jax.experimental import pallas as pl
from jax.experimental.pallas import tpu as pltpu


def _layernorm_f32(v, w_ref, b_ref, eps=1e-5):
    w = w_ref[...].astype(jnp.float32)
    b = b_ref[...].astype(jnp.float32)
    mu = jnp.mean(v, axis=-1, keepdims=True)
    var = jnp.mean((v - mu) ** 2, axis=-1, keepdims=True)
    return (v - mu) * lax.rsqrt(var + eps) * w + b


def _quick_gelu(v):
    return v * jax.nn.sigmoid(1.702 * v)


def _decoder_block_kernel(
    # per-step activation slabs
    x_ref, y_ref,
    # attention params (wkv is the fused K|V projection)
    wq_ref, bq_ref, wkv_ref, bkv_ref, wo_ref, bo_ref,
    # layernorm params
    ln1w_ref, ln1b_ref, ln2w_ref, ln2b_ref, ln3w_ref, ln3b_ref,
    # mlp params
    wfc_ref, bfc_ref, wproj_ref, bproj_ref,
    # output
    o_ref,
    *, n_head: int, head_dim: int, mlp_chunk: int,
):
    f32 = jnp.float32
    w_dtype = wq_ref.dtype
    d_model = n_head * head_dim

    x = x_ref[...].astype(f32)          # (tq, D)  residual stream in f32
    y = y_ref[...].astype(f32)          # (Ty, D)

    # --- attention branch: attention(ln_1(x), ln_3(y)) ---
    xn = _layernorm_f32(x, ln1w_ref, ln1b_ref)
    yn = _layernorm_f32(y, ln3w_ref, ln3b_ref)

    q = jnp.dot(xn.astype(w_dtype), wq_ref[...],
                preferred_element_type=f32) + bq_ref[...].astype(f32)
    kv = jnp.dot(yn.astype(w_dtype), wkv_ref[...],
                 preferred_element_type=f32) + bkv_ref[...].astype(f32)
    k = kv[:, :d_model]
    v = kv[:, d_model:]
    q = q * (1.0 / (head_dim ** 0.5))   # scale hoisted onto q (once, not per-head)

    # per-head attention with the output projection folded into the loop
    # (avoids keeping all head outputs live + a concatenate).
    attn = jnp.zeros((x.shape[0], d_model), f32)
    contract_last = (((1,), (1,)), ((), ()))   # A @ B^T without materializing B^T
    for h in range(n_head):                    # static unrolled, aligned lane slices
        sl = slice(h * head_dim, (h + 1) * head_dim)
        qh = q[:, sl].astype(w_dtype)
        kh = k[:, sl].astype(w_dtype)
        vh = v[:, sl].astype(w_dtype)
        s = lax.dot_general(qh, kh, contract_last,
                            preferred_element_type=f32)          # (tq, Ty)
        s = s - jnp.max(s, axis=-1, keepdims=True)
        p = jnp.exp(s)
        p = p * pl.reciprocal(jnp.sum(p, axis=-1, keepdims=True), approx=True)
        oh = jnp.dot(p.astype(w_dtype), vh,
                     preferred_element_type=f32)                 # (tq, hd)
        attn = attn + jnp.dot(oh.astype(w_dtype), wo_ref[sl, :],
                              preferred_element_type=f32)        # (tq, D)
    x = x + attn + bo_ref[...].astype(f32)

    # --- MLP branch: x + c_proj(QuickGELU(c_fc(ln_2(x)))) , chunked over d_mlp ---
    xn2 = _layernorm_f32(x, ln2w_ref, ln2b_ref).astype(w_dtype)
    d_mlp = wfc_ref.shape[1]
    h2 = jnp.zeros((x.shape[0], d_model), f32)
    for c in range(0, d_mlp, mlp_chunk):
        csl = slice(c, c + mlp_chunk)
        h1 = jnp.dot(xn2, wfc_ref[:, csl],
                     preferred_element_type=f32) + bfc_ref[:, csl].astype(f32)
        h1 = _quick_gelu(h1)
        h2 = h2 + jnp.dot(h1.astype(w_dtype), wproj_ref[csl, :],
                          preferred_element_type=f32)
    x = x + h2 + bproj_ref[...].astype(f32)

    o_ref[...] = x.astype(o_ref.dtype)


def _pick_tile(T, candidates=(512, 256, 128, 64, 32, 16, 8)):
    for c in candidates:
        if T % c == 0:
            return c
    return T   # fall back to the full dimension (always legal)


def residual_decoder_block(x, y, params, n_head, *, interpret=False):
    """x: (Tx, N, D), y: (Ty, N, D) sequence-first, like nn.MultiheadAttention."""
    Tx, N, D = x.shape
    Ty = y.shape[0]
    assert D % n_head == 0
    head_dim = D // n_head
    d_mlp = params["wfc_t"].shape[1]

    tq = _pick_tile(Tx)
    n_q = Tx // tq
    if d_mlp > 2048:
        mlp_chunk = next((c for c in (2048, 1024, 512, 256) if d_mlp % c == 0), d_mlp)
    else:
        mlp_chunk = d_mlp

    # batch-major so every grid step gets a lane-dense (T, D) slab with
    # full-extent last-two block dims (legal for any N).
    xb = jnp.transpose(x, (1, 0, 2))  # (N, Tx, D)
    yb = jnp.transpose(y, (1, 0, 2))  # (N, Ty, D)

    # fuse K and V projections into one (D, 2D) matmul
    wkv_t = jnp.concatenate([params["wk_t"], params["wv_t"]], axis=1)
    bkv = jnp.concatenate([params["bk"], params["bv"]], axis=1)

    param_list = [
        params["wq_t"], params["bq"], wkv_t, bkv,
        params["wo_t"], params["bo"],
        params["ln1_w"], params["ln1_b"], params["ln2_w"], params["ln2_b"],
        params["ln3_w"], params["ln3_b"],
        params["wfc_t"], params["bfc"], params["wproj_t"], params["bproj"],
    ]

    def rep(shape):
        return pl.BlockSpec(shape, lambda n, i: (0,) * len(shape))

    in_specs = [
        pl.BlockSpec((None, tq, D), lambda n, i: (n, i, 0)),   # x slab (batch squeezed)
        pl.BlockSpec((None, Ty, D), lambda n, i: (n, 0, 0)),   # y slab
        rep((D, D)), rep((1, D)),            # wq_t, bq
        rep((D, 2 * D)), rep((1, 2 * D)),    # wkv_t, bkv
        rep((D, D)), rep((1, D)),            # wo_t, bo
        rep((1, D)), rep((1, D)),            # ln1
        rep((1, D)), rep((1, D)),            # ln2
        rep((1, D)), rep((1, D)),            # ln3
        rep((D, d_mlp)), rep((1, d_mlp)),    # wfc_t, bfc
        rep((d_mlp, D)), rep((1, D)),        # wproj_t, bproj
    ]

    itemsize = jnp.dtype(x.dtype).itemsize
    w_bytes = sum(int(p.size) * jnp.dtype(p.dtype).itemsize for p in param_list)
    blk_bytes = (2 * tq * D + Ty * D) * itemsize
    vmem_limit = int(min(max(2 * (w_bytes + blk_bytes) + (8 << 20), 32 << 20), 64 << 20))

    flops = 2 * N * (Tx * D * D            # q projection
                     + Ty * D * 2 * D      # fused kv projection
                     + 2 * n_head * Tx * Ty * head_dim   # QK^T + PV
                     + Tx * D * D          # out projection
                     + 2 * Tx * D * d_mlp) # MLP
    transcendentals = N * (n_head * Tx * Ty + Tx * d_mlp)
    bytes_accessed = int((2 * x.size + y.size) * itemsize + w_bytes)

    out = pl.pallas_call(
        functools.partial(_decoder_block_kernel, n_head=n_head,
                          head_dim=head_dim, mlp_chunk=mlp_chunk),
        out_shape=jax.ShapeDtypeStruct((N, Tx, D), x.dtype),
        grid=(N, n_q),
        in_specs=in_specs,
        out_specs=pl.BlockSpec((None, tq, D), lambda n, i: (n, i, 0)),
        compiler_params=pltpu.CompilerParams(
            dimension_semantics=("parallel", "parallel"),
            vmem_limit_bytes=vmem_limit),
        cost_estimate=pl.CostEstimate(
            flops=int(flops), transcendentals=int(transcendentals),
            bytes_accessed=int(bytes_accessed)),
        interpret=interpret,
    )(xb, yb, *param_list)

    return jnp.transpose(out, (1, 0, 2))  # back to (Tx, N, D)


def make_params(key, d_model, n_head, mlp_factor=4.0, dtype=jnp.float32):
    d_mlp = round(mlp_factor * d_model)
    ks = jax.random.split(key, 8)

    def xavier(k, shape):
        fan_in, fan_out = shape[1], shape[0]
        limit = (6.0 / (fan_in + fan_out)) ** 0.5
        return jax.random.uniform(k, shape, jnp.float32, -limit, limit)

    in_proj_w = xavier(ks[0], (3 * d_model, d_model))
    in_proj_b = 0.02 * jax.random.normal(ks[1], (3 * d_model,), jnp.float32)
    wq, wk, wv = in_proj_w[:d_model], in_proj_w[d_model:2 * d_model], in_proj_w[2 * d_model:]
    bq, bk, bv = in_proj_b[:d_model], in_proj_b[d_model:2 * d_model], in_proj_b[2 * d_model:]
    # out_proj / c_proj are zero in the original __init__; small random here so the
    # kernel path is exercised (forward math unchanged).
    wo = 0.02 * jax.random.normal(ks[2], (d_model, d_model), jnp.float32)
    bo = 0.02 * jax.random.normal(ks[3], (d_model,), jnp.float32)
    wfc = xavier(ks[4], (d_mlp, d_model))
    bfc = 0.02 * jax.random.normal(ks[5], (d_mlp,), jnp.float32)
    wproj = 0.02 * jax.random.normal(ks[6], (d_model, d_mlp), jnp.float32)
    bproj = 0.02 * jax.random.normal(ks[7], (d_model,), jnp.float32)

    ones = jnp.ones((1, d_model), jnp.float32)
    zeros = jnp.zeros((1, d_model), jnp.float32)

    cast = lambda a: a.astype(dtype)
    return {
        "wq_t": cast(wq.T), "bq": cast(bq[None, :]),
        "wk_t": cast(wk.T), "bk": cast(bk[None, :]),
        "wv_t": cast(wv.T), "bv": cast(bv[None, :]),
        "wo_t": cast(wo.T), "bo": cast(bo[None, :]),
        "ln1_w": cast(ones), "ln1_b": cast(zeros),
        "ln2_w": cast(ones), "ln2_b": cast(zeros),
        "ln3_w": cast(ones), "ln3_b": cast(zeros),
        "wfc_t": cast(wfc.T), "bfc": cast(bfc[None, :]),
        "wproj_t": cast(wproj.T), "bproj": cast(bproj[None, :]),
    }


def reference(x, y, p, n_head):
    """Pure-JAX replica of ResidualDecoderBlock.forward (PyTorch semantics)."""
    Tx, N, D = x.shape
    Ty = y.shape[0]
    hd = D // n_head
    f32 = jnp.float32

    def ln(v, w, b):
        mu = v.mean(-1, keepdims=True)
        var = ((v - mu) ** 2).mean(-1, keepdims=True)
        return (v - mu) / jnp.sqrt(var + 1e-5) * w[0].astype(f32) + b[0].astype(f32)

    xn = ln(x, p["ln1_w"], p["ln1_b"])
    yn = ln(y, p["ln3_w"], p["ln3_b"])
    q = xn @ p["wq_t"].astype(f32) + p["bq"][0].astype(f32)
    k = yn @ p["wk_t"].astype(f32) + p["bk"][0].astype(f32)
    v = yn @ p["wv_t"].astype(f32) + p["bv"][0].astype(f32)
    q = q.reshape(Tx, N, n_head, hd).transpose(1, 2, 0, 3)
    k = k.reshape(Ty, N, n_head, hd).transpose(1, 2, 0, 3)
    v = v.reshape(Ty, N, n_head, hd).transpose(1, 2, 0, 3)
    aff = (q @ jnp.swapaxes(k, -2, -1)) / (hd ** 0.5)
    aff = jax.nn.softmax(aff, axis=-1)
    out = aff @ v
    out = out.transpose(2, 0, 1, 3).reshape(Tx, N, D)
    out = out @ p["wo_t"].astype(f32) + p["bo"][0].astype(f32)
    x = x + out
    xn2 = ln(x, p["ln2_w"], p["ln2_b"])
    h = xn2 @ p["wfc_t"].astype(f32) + p["bfc"][0].astype(f32)
    h = h * jax.nn.sigmoid(1.702 * h)
    h = h @ p["wproj_t"].astype(f32) + p["bproj"][0].astype(f32)
    return x + h


if __name__ == "__main__":
    d_model, n_head, mlp_factor = 32, 4, 4.0
    Tx, Ty, N = 8, 8, 2

    key = jax.random.PRNGKey(0)
    kx, ky, kp = jax.random.split(key, 3)
    x = jax.random.normal(kx, (Tx, N, d_model), jnp.float32)
    y = jax.random.normal(ky, (Ty, N, d_model), jnp.float32)
    # f32 params for a tight correctness check; bf16 params (dtype=jnp.bfloat16)
    # are supported by the kernel and halve weight VMEM on v6e/v7x.
    params = make_params(kp, d_model, n_head, mlp_factor, dtype=jnp.float32)

    out = residual_decoder_block(x, y, params, n_head)
    out = jax.block_until_ready(out)

    ref = reference(x, y, params, n_head)
    assert out.shape == (Tx, N, d_model)
    # approx-reciprocal softmax denominator -> slightly looser tolerance than 1e-4
    assert jnp.allclose(out, ref, atol=5e-3, rtol=5e-3), float(jnp.max(jnp.abs(out - ref)))

    # TODO(synk): nn.Dropout / DropPath are identity at p=0 (inference); no kernel needed.
    print("KERNEL_OK")
</pallas_src>

<mosaic_0001>
module attributes {stable_mosaic.version = 11 : i64} {
  func.func @_decoder_block_kernel(%arg0: i32, %arg1: i32, %arg2: memref<1x8x32xf32, #tpu.memory_space<vmem>>, %arg3: memref<1x8x32xf32, #tpu.memory_space<vmem>>, %arg4: memref<32x32xf32, #tpu.memory_space<vmem>>, %arg5: memref<1x32xf32, #tpu.memory_space<vmem>>, %arg6: memref<32x64xf32, #tpu.memory_space<vmem>>, %arg7: memref<1x64xf32, #tpu.memory_space<vmem>>, %arg8: memref<32x32xf32, #tpu.memory_space<vmem>>, %arg9: memref<1x32xf32, #tpu.memory_space<vmem>>, %arg10: memref<1x32xf32, #tpu.memory_space<vmem>>, %arg11: memref<1x32xf32, #tpu.memory_space<vmem>>, %arg12: memref<1x32xf32, #tpu.memory_space<vmem>>, %arg13: memref<1x32xf32, #tpu.memory_space<vmem>>, %arg14: memref<1x32xf32, #tpu.memory_space<vmem>>, %arg15: memref<1x32xf32, #tpu.memory_space<vmem>>, %arg16: memref<32x128xf32, #tpu.memory_space<vmem>>, %arg17: memref<1x128xf32, #tpu.memory_space<vmem>>, %arg18: memref<128x32xf32, #tpu.memory_space<vmem>>, %arg19: memref<1x32xf32, #tpu.memory_space<vmem>>, %arg20: memref<1x8x32xf32, #tpu.memory_space<vmem>>) attributes {dimension_semantics = [#tpu.dimension_semantics<parallel>, #tpu.dimension_semantics<parallel>], iteration_bounds = array<i64: 2, 1>, scalar_prefetch = 0 : i64, scratch_operands = 0 : i64, tpu.core_type = #tpu.core_type<tc>, window_params = [{transform_indices = @transform_0, window_bounds = array<i64: 1, 8, 32>}, {transform_indices = @transform_1, window_bounds = array<i64: 1, 8, 32>}, {pipeline_mode = #tpu.pipeline_mode<synchronous>, transform_indices = @transform_2, window_bounds = array<i64: 32, 32>}, {pipeline_mode = #tpu.pipeline_mode<synchronous>, transform_indices = @transform_3, window_bounds = array<i64: 1, 32>}, {pipeline_mode = #tpu.pipeline_mode<synchronous>, transform_indices = @transform_4, window_bounds = array<i64: 32, 64>}, {pipeline_mode = #tpu.pipeline_mode<synchronous>, transform_indices = @transform_5, window_bounds = array<i64: 1, 64>}, {pipeline_mode = #tpu.pipeline_mode<synchronous>, transform_indices = @transform_6, window_bounds = array<i64: 32, 32>}, {pipeline_mode = #tpu.pipeline_mode<synchronous>, transform_indices = @transform_7, window_bounds = array<i64: 1, 32>}, {pipeline_mode = #tpu.pipeline_mode<synchronous>, transform_indices = @transform_8, window_bounds = array<i64: 1, 32>}, {pipeline_mode = #tpu.pipeline_mode<synchronous>, transform_indices = @transform_9, window_bounds = array<i64: 1, 32>}, {pipeline_mode = #tpu.pipeline_mode<synchronous>, transform_indices = @transform_10, window_bounds = array<i64: 1, 32>}, {pipeline_mode = #tpu.pipeline_mode<synchronous>, transform_indices = @transform_11, window_bounds = array<i64: 1, 32>}, {pipeline_mode = #tpu.pipeline_mode<synchronous>, transform_indices = @transform_12, window_bounds = array<i64: 1, 32>}, {pipeline_mode = #tpu.pipeline_mode<synchronous>, transform_indices = @transform_13, window_bounds = array<i64: 1, 32>}, {pipeline_mode = #tpu.pipeline_mode<synchronous>, transform_indices = @transform_14, window_bounds = array<i64: 32, 128>}, {pipeline_mode = #tpu.pipeline_mode<synchronous>, transform_indices = @transform_15, window_bounds = array<i64: 1, 128>}, {pipeline_mode = #tpu.pipeline_mode<synchronous>, transform_indices = @transform_16, window_bounds = array<i64: 128, 32>}, {pipeline_mode = #tpu.pipeline_mode<synchronous>, transform_indices = @transform_17, window_bounds = array<i64: 1, 32>}, {transform_indices = @transform_18, window_bounds = array<i64: 1, 8, 32>}]} {
    %c0 = arith.constant 0 : index
    %c0_0 = arith.constant 0 : index
    %c0_1 = arith.constant 0 : index
    %0 = vector.load %arg2[%c0, %c0_0, %c0_1] : memref<1x8x32xf32, #tpu.memory_space<vmem>>, vector<1x8x32xf32>
    %1 = vector.shape_cast %0 : vector<1x8x32xf32> to vector<8x32xf32>
    %c0_2 = arith.constant 0 : index
    %c0_3 = arith.constant 0 : index
    %c0_4 = arith.constant 0 : index
    %2 = vector.load %arg3[%c0_2, %c0_3, %c0_4] : memref<1x8x32xf32, #tpu.memory_space<vmem>>, vector<1x8x32xf32>
    %3 = vector.shape_cast %2 : vector<1x8x32xf32> to vector<8x32xf32>
    %c0_5 = arith.constant 0 : index
    %c0_6 = arith.constant 0 : index
    %4 = vector.load %arg10[%c0_5, %c0_6] : memref<1x32xf32, #tpu.memory_space<vmem>>, vector<1x32xf32>
    %c0_7 = arith.constant 0 : index
    %c0_8 = arith.constant 0 : index
    %5 = vector.load %arg11[%c0_7, %c0_8] : memref<1x32xf32, #tpu.memory_space<vmem>>, vector<1x32xf32>
    %cst = arith.constant dense<0.000000e+00> : vector<8xf32>
    %6 = vector.multi_reduction <add>, %1, %cst [1] : vector<8x32xf32> to vector<8xf32>
    %7 = vector.shape_cast %6 : vector<8xf32> to vector<8x1xf32>
    %cst_9 = arith.constant 3.200000e+01 : f32
    %8 = vector.broadcast %cst_9 : f32 to vector<8x1xf32>
    %9 = arith.divf %7, %8 : vector<8x1xf32>
    %10 = vector.broadcast %9 : vector<8x1xf32> to vector<8x32xf32>
    %11 = arith.subf %1, %10 : vector<8x32xf32>
    %12 = arith.mulf %11, %11 : vector<8x32xf32>
    %cst_10 = arith.constant dense<0.000000e+00> : vector<8xf32>
    %13 = vector.multi_reduction <add>, %12, %cst_10 [1] : vector<8x32xf32> to vector<8xf32>
    %14 = vector.shape_cast %13 : vector<8xf32> to vector<8x1xf32>
    %cst_11 = arith.constant 3.200000e+01 : f32
    %15 = vector.broadcast %cst_11 : f32 to vector<8x1xf32>
    %16 = arith.divf %14, %15 : vector<8x1xf32>
    %17 = vector.broadcast %9 : vector<8x1xf32> to vector<8x32xf32>
    %18 = arith.subf %1, %17 : vector<8x32xf32>
    %cst_12 = arith.constant 9.99999974E-6 : f32
    %19 = vector.broadcast %cst_12 : f32 to vector<8x1xf32>
    %20 = arith.addf %16, %19 : vector<8x1xf32>
    %21 = math.rsqrt %20 : vector<8x1xf32>
    %22 = vector.broadcast %21 : vector<8x1xf32> to vector<8x32xf32>
    %23 = arith.mulf %18, %22 : vector<8x32xf32>
    %24 = vector.broadcast %4 : vector<1x32xf32> to vector<8x32xf32>
    %25 = arith.mulf %23, %24 : vector<8x32xf32>
    %26 = vector.broadcast %5 : vector<1x32xf32> to vector<8x32xf32>
    %27 = arith.addf %25, %26 : vector<8x32xf32>
    %c0_13 = arith.constant 0 : index
    %c0_14 = arith.constant 0 : index
    %28 = vector.load %arg14[%c0_13, %c0_14] : memref<1x32xf32, #tpu.memory_space<vmem>>, vector<1x32xf32>
    %c0_15 = arith.constant 0 : index
    %c0_16 = arith.constant 0 : index
    %29 = vector.load %arg15[%c0_15, %c0_16] : memref<1x32xf32, #tpu.memory_space<vmem>>, vector<1x32xf32>
    %cst_17 = arith.constant dense<0.000000e+00> : vector<8xf32>
    %30 = vector.multi_reduction <add>, %3, %cst_17 [1] : vector<8x32xf32> to vector<8xf32>
    %31 = vector.shape_cast %30 : vector<8xf32> to vector<8x1xf32>
    %cst_18 = arith.constant 3.200000e+01 : f32
    %32 = vector.broadcast %cst_18 : f32 to vector<8x1xf32>
    %33 = arith.divf %31, %32 : vector<8x1xf32>
    %34 = vector.broadcast %33 : vector<8x1xf32> to vector<8x32xf32>
    %35 = arith.subf %3, %34 : vector<8x32xf32>
    %36 = arith.mulf %35, %35 : vector<8x32xf32>
    %cst_19 = arith.constant dense<0.000000e+00> : vector<8xf32>
    %37 = vector.multi_reduction <add>, %36, %cst_19 [1] : vector<8x32xf32> to vector<8xf32>
    %38 = vector.shape_cast %37 : vector<8xf32> to vector<8x1xf32>
    %cst_20 = arith.constant 3.200000e+01 : f32
    %39 = vector.broadcast %cst_20 : f32 to vector<8x1xf32>
    %40 = arith.divf %38, %39 : vector<8x1xf32>
    %41 = vector.broadcast %33 : vector<8x1xf32> to vector<8x32xf32>
    %42 = arith.subf %3, %41 : vector<8x32xf32>
    %cst_21 = arith.constant 9.99999974E-6 : f32
    %43 = vector.broadcast %cst_21 : f32 to vector<8x1xf32>
    %44 = arith.addf %40, %43 : vector<8x1xf32>
    %45 = math.rsqrt %44 : vector<8x1xf32>
    %46 = vector.broadcast %45 : vector<8x1xf32> to vector<8x32xf32>
    %47 = arith.mulf %42, %46 : vector<8x32xf32>
    %48 = vector.broadcast %28 : vector<1x32xf32> to vector<8x32xf32>
    %49 = arith.mulf %47, %48 : vector<8x32xf32>
    %50 = vector.broadcast %29 : vector<1x32xf32> to vector<8x32xf32>
    %51 = arith.addf %49, %50 : vector<8x32xf32>
    %c0_22 = arith.constant 0 : index
    %c0_23 = arith.constant 0 : index
    %52 = vector.load %arg4[%c0_22, %c0_23] : memref<32x32xf32, #tpu.memory_space<vmem>>, vector<32x32xf32>
    %cst_24 = arith.constant dense<0.000000e+00> : vector<8x32xf32>
    %53 = tpu.matmul %27, %52, %cst_24 {dimension_numbers = #tpu.dot_dimension_numbers<[1], [0], [0], [1], [0, 0, 1, 1], [], []>} : vector<8x32xf32>, vector<32x32xf32>, vector<8x32xf32> -> vector<8x32xf32>
    %c0_25 = arith.constant 0 : index
    %c0_26 = arith.constant 0 : index
    %54 = vector.load %arg5[%c0_25, %c0_26] : memref<1x32xf32, #tpu.memory_space<vmem>>, vector<1x32xf32>
    %55 = vector.broadcast %54 : vector<1x32xf32> to vector<8x32xf32>
    %56 = arith.addf %53, %55 : vector<8x32xf32>
    %c0_27 = arith.constant 0 : index
    %c0_28 = arith.constant 0 : index
    %57 = vector.load %arg6[%c0_27, %c0_28] : memref<32x64xf32, #tpu.memory_space<vmem>>, vector<32x64xf32>
    %cst_29 = arith.constant dense<0.000000e+00> : vector<8x64xf32>
    %58 = tpu.matmul %51, %57, %cst_29 {dimension_numbers = #tpu.dot_dimension_numbers<[1], [0], [0], [1], [0, 0, 1, 1], [], []>} : vector<8x32xf32>, vector<32x64xf32>, vector<8x64xf32> -> vector<8x64xf32>
    %c0_30 = arith.constant 0 : index
    %c0_31 = arith.constant 0 : index
    %59 = vector.load %arg7[%c0_30, %c0_31] : memref<1x64xf32, #tpu.memory_space<vmem>>, vector<1x64xf32>
    %60 = vector.broadcast %59 : vector<1x64xf32> to vector<8x64xf32>
    %61 = arith.addf %58, %60 : vector<8x64xf32>
    %62 = vector.extract_strided_slice %61 {offsets = [0, 0], sizes = [8, 32], strides = [1, 1]} : vector<8x64xf32> to vector<8x32xf32>
    %63 = vector.extract_strided_slice %61 {offsets = [0, 32], sizes = [8, 32], strides = [1, 1]} : vector<8x64xf32> to vector<8x32xf32>
    %cst_32 = arith.constant 0.353553385 : f32
    %64 = vector.broadcast %cst_32 : f32 to vector<8x32xf32>
    %65 = arith.mulf %56, %64 : vector<8x32xf32>
    %cst_33 = arith.constant 0.000000e+00 : f32
    %66 = vector.broadcast %cst_33 : f32 to vector<8x32xf32>
    %67 = vector.extract_strided_slice %65 {offsets = [0, 0], sizes = [8, 8], strides = [1, 1]} : vector<8x32xf32> to vector<8x8xf32>
    %68 = vector.extract_strided_slice %62 {offsets = [0, 0], sizes = [8, 8], strides = [1, 1]} : vector<8x32xf32> to vector<8x8xf32>
    %69 = vector.extract_strided_slice %63 {offsets = [0, 0], sizes = [8, 8], strides = [1, 1]} : vector<8x32xf32> to vector<8x8xf32>
    %cst_34 = arith.constant dense<0.000000e+00> : vector<8x8xf32>
    %70 = tpu.matmul %67, %68, %cst_34 {dimension_numbers = #tpu.dot_dimension_numbers<[1], [1], [0], [0], [0, 0, 1, 0], [], []>} : vector<8x8xf32>, vector<8x8xf32>, vector<8x8xf32> -> vector<8x8xf32>
    %cst_35 = arith.constant dense<0xFF800000> : vector<8xf32>
    %71 = vector.multi_reduction <maximumf>, %70, %cst_35 [1] : vector<8x8xf32> to vector<8xf32>
    %72 = vector.shape_cast %71 : vector<8xf32> to vector<8x1xf32>
    %73 = vector.broadcast %72 : vector<8x1xf32> to vector<8x8xf32>
    %74 = arith.subf %70, %73 : vector<8x8xf32>
    %75 = math.exp %74 : vector<8x8xf32>
    %cst_36 = arith.constant dense<0.000000e+00> : vector<8xf32>
    %76 = vector.multi_reduction <add>, %75, %cst_36 [1] : vector<8x8xf32> to vector<8xf32>
    %77 = vector.shape_cast %76 : vector<8xf32> to vector<8x1xf32>
    %78 = tpu.reciprocal %77 {approx = true} : vector<8x1xf32> -> vector<8x1xf32>
    %79 = vector.broadcast %78 : vector<8x1xf32> to vector<8x8xf32>
    %80 = arith.mulf %75, %79 : vector<8x8xf32>
    %cst_37 = arith.constant dense<0.000000e+00> : vector<8x8xf32>
    %81 = tpu.matmul %80, %69, %cst_37 {dimension_numbers = #tpu.dot_dimension_numbers<[1], [0], [0], [1], [0, 0, 1, 1], [], []>} : vector<8x8xf32>, vector<8x8xf32>, vector<8x8xf32> -> vector<8x8xf32>
    %c0_38 = arith.constant 0 : index
    %c0_39 = arith.constant 0 : index
    %82 = vector.load %arg8[%c0_38, %c0_39] : memref<32x32xf32, #tpu.memory_space<vmem>>, vector<8x32xf32>
    %cst_40 = arith.constant dense<0.000000e+00> : vector<8x32xf32>
    %83 = tpu.matmul %81, %82, %cst_40 {dimension_numbers = #tpu.dot_dimension_numbers<[1], [0], [0], [1], [0, 0, 1, 1], [], []>} : vector<8x8xf32>, vector<8x32xf32>, vector<8x32xf32> -> vector<8x32xf32>
    %84 = arith.addf %66, %83 : vector<8x32xf32>
    %85 = vector.extract_strided_slice %65 {offsets = [0, 8], sizes = [8, 8], strides = [1, 1]} : vector<8x32xf32> to vector<8x8xf32>
    %86 = vector.extract_strided_slice %62 {offsets = [0, 8], sizes = [8, 8], strides = [1, 1]} : vector<8x32xf32> to vector<8x8xf32>
    %87 = vector.extract_strided_slice %63 {offsets = [0, 8], sizes = [8, 8], strides = [1, 1]} : vector<8x32xf32> to vector<8x8xf32>
    %cst_41 = arith.constant dense<0.000000e+00> : vector<8x8xf32>
    %88 = tpu.matmul %85, %86, %cst_41 {dimension_numbers = #tpu.dot_dimension_numbers<[1], [1], [0], [0], [0, 0, 1, 0], [], []>} : vector<8x8xf32>, vector<8x8xf32>, vector<8x8xf32> -> vector<8x8xf32>
    %cst_42 = arith.constant dense<0xFF800000> : vector<8xf32>
    %89 = vector.multi_reduction <maximumf>, %88, %cst_42 [1] : vector<8x8xf32> to vector<8xf32>
    %90 = vector.shape_cast %89 : vector<8xf32> to vector<8x1xf32>
    %91 = vector.broadcast %90 : vector<8x1xf32> to vector<8x8xf32>
    %92 = arith.subf %88, %91 : vector<8x8xf32>
    %93 = math.exp %92 : vector<8x8xf32>
    %cst_43 = arith.constant dense<0.000000e+00> : vector<8xf32>
    %94 = vector.multi_reduction <add>, %93, %cst_43 [1] : vector<8x8xf32> to vector<8xf32>
    %95 = vector.shape_cast %94 : vector<8xf32> to vector<8x1xf32>
    %96 = tpu.reciprocal %95 {approx = true} : vector<8x1xf32> -> vector<8x1xf32>
    %97 = vector.broadcast %96 : vector<8x1xf32> to vector<8x8xf32>
    %98 = arith.mulf %93, %97 : vector<8x8xf32>
    %cst_44 = arith.constant dense<0.000000e+00> : vector<8x8xf32>
    %99 = tpu.matmul %98, %87, %cst_44 {dimension_numbers = #tpu.dot_dimension_numbers<[1], [0], [0], [1], [0, 0, 1, 1], [], []>} : vector<8x8xf32>, vector<8x8xf32>, vector<8x8xf32> -> vector<8x8xf32>
    %c8 = arith.constant 8 : index
    %c0_45 = arith.constant 0 : index
    %100 = vector.load %arg8[%c8, %c0_45] : memref<32x32xf32, #tpu.memory_space<vmem>>, vector<8x32xf32>
    %cst_46 = arith.constant dense<0.000000e+00> : vector<8x32xf32>
    %101 = tpu.matmul %99, %100, %cst_46 {dimension_numbers = #tpu.dot_dimension_numbers<[1], [0], [0], [1], [0, 0, 1, 1], [], []>} : vector<8x8xf32>, vector<8x32xf32>, vector<8x32xf32> -> vector<8x32xf32>
    %102 = arith.addf %84, %101 : vector<8x32xf32>
    %103 = vector.extract_strided_slice %65 {offsets = [0, 16], sizes = [8, 8], strides = [1, 1]} : vector<8x32xf32> to vector<8x8xf32>
    %104 = vector.extract_strided_slice %62 {offsets = [0, 16], sizes = [8, 8], strides = [1, 1]} : vector<8x32xf32> to vector<8x8xf32>
    %105 = vector.extract_strided_slice %63 {offsets = [0, 16], sizes = [8, 8], strides = [1, 1]} : vector<8x32xf32> to vector<8x8xf32>
    %cst_47 = arith.constant dense<0.000000e+00> : vector<8x8xf32>
    %106 = tpu.matmul %103, %104, %cst_47 {dimension_numbers = #tpu.dot_dimension_numbers<[1], [1], [0], [0], [0, 0, 1, 0], [], []>} : vector<8x8xf32>, vector<8x8xf32>, vector<8x8xf32> -> vector<8x8xf32>
    %cst_48 = arith.constant dense<0xFF800000> : vector<8xf32>
    %107 = vector.multi_reduction <maximumf>, %106, %cst_48 [1] : vector<8x8xf32> to vector<8xf32>
    %108 = vector.shape_cast %107 : vector<8xf32> to vector<8x1xf32>
    %109 = vector.broadcast %108 : vector<8x1xf32> to vector<8x8xf32>
    %110 = arith.subf %106, %109 : vector<8x8xf32>
    %111 = math.exp %110 : vector<8x8xf32>
    %cst_49 = arith.constant dense<0.000000e+00> : vector<8xf32>
    %112 = vector.multi_reduction <add>, %111, %cst_49 [1] : vector<8x8xf32> to vector<8xf32>
    %113 = vector.shape_cast %112 : vector<8xf32> to vector<8x1xf32>
    %114 = tpu.reciprocal %113 {approx = true} : vector<8x1xf32> -> vector<8x1xf32>
    %115 = vector.broadcast %114 : vector<8x1xf32> to vector<8x8xf32>
    %116 = arith.mulf %111, %115 : vector<8x8xf32>
    %cst_50 = arith.constant dense<0.000000e+00> : vector<8x8xf32>
    %117 = tpu.matmul %116, %105, %cst_50 {dimension_numbers = #tpu.dot_dimension_numbers<[1], [0], [0], [1], [0, 0, 1, 1], [], []>} : vector<8x8xf32>, vector<8x8xf32>, vector<8x8xf32> -> vector<8x8xf32>
    %c16 = arith.constant 16 : index
    %c0_51 = arith.constant 0 : index
    %118 = vector.load %arg8[%c16, %c0_51] : memref<32x32xf32, #tpu.memory_space<vmem>>, vector<8x32xf32>
    %cst_52 = arith.constant dense<0.000000e+00> : vector<8x32xf32>
    %119 = tpu.matmul %117, %118, %cst_52 {dimension_numbers = #tpu.dot_dimension_numbers<[1], [0], [0], [1], [0, 0, 1, 1], [], []>} : vector<8x8xf32>, vector<8x32xf32>, vector<8x32xf32> -> vector<8x32xf32>
    %120 = arith.addf %102, %119 : vector<8x32xf32>
    %121 = vector.extract_strided_slice %65 {offsets = [0, 24], sizes = [8, 8], strides = [1, 1]} : vector<8x32xf32> to vector<8x8xf32>
    %122 = vector.extract_strided_slice %62 {offsets = [0, 24], sizes = [8, 8], strides = [1, 1]} : vector<8x32xf32> to vector<8x8xf32>
    %123 = vector.extract_strided_slice %63 {offsets = [0, 24], sizes = [8, 8], strides = [1, 1]} : vector<8x32xf32> to vector<8x8xf32>
    %cst_53 = arith.constant dense<0.000000e+00> : vector<8x8xf32>
    %124 = tpu.matmul %121, %122, %cst_53 {dimension_numbers = #tpu.dot_dimension_numbers<[1], [1], [0], [0], [0, 0, 1, 0], [], []>} : vector<8x8xf32>, vector<8x8xf32>, vector<8x8xf32> -> vector<8x8xf32>
    %cst_54 = arith.constant dense<0xFF800000> : vector<8xf32>
    %125 = vector.multi_reduction <maximumf>, %124, %cst_54 [1] : vector<8x8xf32> to vector<8xf32>
    %126 = vector.shape_cast %125 : vector<8xf32> to vector<8x1xf32>
    %127 = vector.broadcast %126 : vector<8x1xf32> to vector<8x8xf32>
    %128 = arith.subf %124, %127 : vector<8x8xf32>
    %129 = math.exp %128 : vector<8x8xf32>
    %cst_55 = arith.constant dense<0.000000e+00> : vector<8xf32>
    %130 = vector.multi_reduction <add>, %129, %cst_55 [1] : vector<8x8xf32> to vector<8xf32>
    %131 = vector.shape_cast %130 : vector<8xf32> to vector<8x1xf32>
    %132 = tpu.reciprocal %131 {approx = true} : vector<8x1xf32> -> vector<8x1xf32>
    %133 = vector.broadcast %132 : vector<8x1xf32> to vector<8x8xf32>
    %134 = arith.mulf %129, %133 : vector<8x8xf32>
    %cst_56 = arith.constant dense<0.000000e+00> : vector<8x8xf32>
    %135 = tpu.matmul %134, %123, %cst_56 {dimension_numbers = #tpu.dot_dimension_numbers<[1], [0], [0], [1], [0, 0, 1, 1], [], []>} : vector<8x8xf32>, vector<8x8xf32>, vector<8x8xf32> -> vector<8x8xf32>
    %c24 = arith.constant 24 : index
    %c0_57 = arith.constant 0 : index
    %136 = vector.load %arg8[%c24, %c0_57] : memref<32x32xf32, #tpu.memory_space<vmem>>, vector<8x32xf32>
    %cst_58 = arith.constant dense<0.000000e+00> : vector<8x32xf32>
    %137 = tpu.matmul %135, %136, %cst_58 {dimension_numbers = #tpu.dot_dimension_numbers<[1], [0], [0], [1], [0, 0, 1, 1], [], []>} : vector<8x8xf32>, vector<8x32xf32>, vector<8x32xf32> -> vector<8x32xf32>
    %138 = arith.addf %120, %137 : vector<8x32xf32>
    %139 = arith.addf %1, %138 : vector<8x32xf32>
    %c0_59 = arith.constant 0 : index
    %c0_60 = arith.constant 0 : index
    %140 = vector.load %arg9[%c0_59, %c0_60] : memref<1x32xf32, #tpu.memory_space<vmem>>, vector<1x32xf32>
    %141 = vector.broadcast %140 : vector<1x32xf32> to vector<8x32xf32>
    %142 = arith.addf %139, %141 : vector<8x32xf32>
    %c0_61 = arith.constant 0 : index
    %c0_62 = arith.constant 0 : index
    %143 = vector.load %arg12[%c0_61, %c0_62] : memref<1x32xf32, #tpu.memory_space<vmem>>, vector<1x32xf32>
    %c0_63 = arith.constant 0 : index
    %c0_64 = arith.constant 0 : index
    %144 = vector.load %arg13[%c0_63, %c0_64] : memref<1x32xf32, #tpu.memory_space<vmem>>, vector<1x32xf32>
    %cst_65 = arith.constant dense<0.000000e+00> : vector<8xf32>
    %145 = vector.multi_reduction <add>, %142, %cst_65 [1] : vector<8x32xf32> to vector<8xf32>
    %146 = vector.shape_cast %145 : vector<8xf32> to vector<8x1xf32>
    %cst_66 = arith.constant 3.200000e+01 : f32
    %147 = vector.broadcast %cst_66 : f32 to vector<8x1xf32>
    %148 = arith.divf %146, %147 : vector<8x1xf32>
    %149 = vector.broadcast %148 : vector<8x1xf32> to vector<8x32xf32>
    %150 = arith.subf %142, %149 : vector<8x32xf32>
    %151 = arith.mulf %150, %150 : vector<8x32xf32>
    %cst_67 = arith.constant dense<0.000000e+00> : vector<8xf32>
    %152 = vector.multi_reduction <add>, %151, %cst_67 [1] : vector<8x32xf32> to vector<8xf32>
    %153 = vector.shape_cast %152 : vector<8xf32> to vector<8x1xf32>
    %cst_68 = arith.constant 3.200000e+01 : f32
    %154 = vector.broadcast %cst_68 : f32 to vector<8x1xf32>
    %155 = arith.divf %153, %154 : vector<8x1xf32>
    %156 = vector.broadcast %148 : vector<8x1xf32> to vector<8x32xf32>
    %157 = arith.subf %142, %156 : vector<8x32xf32>
    %cst_69 = arith.constant 9.99999974E-6 : f32
    %158 = vector.broadcast %cst_69 : f32 to vector<8x1xf32>
    %159 = arith.addf %155, %158 : vector<8x1xf32>
    %160 = math.rsqrt %159 : vector<8x1xf32>
    %161 = vector.broadcast %160 : vector<8x1xf32> to vector<8x32xf32>
    %162 = arith.mulf %157, %161 : vector<8x32xf32>
    %163 = vector.broadcast %143 : vector<1x32xf32> to vector<8x32xf32>
    %164 = arith.mulf %162, %163 : vector<8x32xf32>
    %165 = vector.broadcast %144 : vector<1x32xf32> to vector<8x32xf32>
    %166 = arith.addf %164, %165 : vector<8x32xf32>
    %cst_70 = arith.constant 0.000000e+00 : f32
    %167 = vector.broadcast %cst_70 : f32 to vector<8x32xf32>
    %c0_71 = arith.constant 0 : index
    %c0_72 = arith.constant 0 : index
    %168 = vector.load %arg16[%c0_71, %c0_72] : memref<32x128xf32, #tpu.memory_space<vmem>>, vector<32x128xf32>
    %cst_73 = arith.constant dense<0.000000e+00> : vector<8x128xf32>
    %169 = tpu.matmul %166, %168, %cst_73 {dimension_numbers = #tpu.dot_dimension_numbers<[1], [0], [0], [1], [0, 0, 1, 1], [], []>} : vector<8x32xf32>, vector<32x128xf32>, vector<8x128xf32> -> vector<8x128xf32>
    %c0_74 = arith.constant 0 : index
    %c0_75 = arith.constant 0 : index
    %170 = vector.load %arg17[%c0_74, %c0_75] : memref<1x128xf32, #tpu.memory_space<vmem>>, vector<1x128xf32>
    %171 = vector.broadcast %170 : vector<1x128xf32> to vector<8x128xf32>
    %172 = arith.addf %169, %171 : vector<8x128xf32>
    %cst_76 = arith.constant 1.702000e+00 : f32
    %173 = vector.broadcast %cst_76 : f32 to vector<8x128xf32>
    %174 = arith.mulf %173, %172 : vector<8x128xf32>
    %175 = arith.negf %174 : vector<8x128xf32>
    %176 = math.exp %175 : vector<8x128xf32>
    %cst_77 = arith.constant 1.000000e+00 : f32
    %177 = vector.broadcast %cst_77 : f32 to vector<8x128xf32>
    %178 = arith.addf %177, %176 : vector<8x128xf32>
    %179 = arith.divf %177, %178 : vector<8x128xf32>
    %180 = arith.mulf %172, %179 : vector<8x128xf32>
    %c0_78 = arith.constant 0 : index
    %c0_79 = arith.constant 0 : index
    %181 = vector.load %arg18[%c0_78, %c0_79] : memref<128x32xf32, #tpu.memory_space<vmem>>, vector<128x32xf32>
    %cst_80 = arith.constant dense<0.000000e+00> : vector<8x32xf32>
    %182 = tpu.matmul %180, %181, %cst_80 {dimension_numbers = #tpu.dot_dimension_numbers<[1], [0], [0], [1], [0, 0, 1, 1], [], []>} : vector<8x128xf32>, vector<128x32xf32>, vector<8x32xf32> -> vector<8x32xf32>
    %183 = arith.addf %167, %182 : vector<8x32xf32>
    %184 = arith.addf %142, %183 : vector<8x32xf32>
    %c0_81 = arith.constant 0 : index
    %c0_82 = arith.constant 0 : index
    %185 = vector.load %arg19[%c0_81, %c0_82] : memref<1x32xf32, #tpu.memory_space<vmem>>, vector<1x32xf32>
    %186 = vector.broadcast %185 : vector<1x32xf32> to vector<8x32xf32>
    %187 = arith.addf %184, %186 : vector<8x32xf32>
    %c0_83 = arith.constant 0 : index
    %c0_84 = arith.constant 0 : index
    %c0_85 = arith.constant 0 : index
    %188 = vector.load %arg20[%c0_83, %c0_84, %c0_85] : memref<1x8x32xf32, #tpu.memory_space<vmem>>, vector<1x8x32xf32>
    %189 = vector.shape_cast %188 : vector<1x8x32xf32> to vector<8x32xf32>
    %190 = vector.shape_cast %187 : vector<8x32xf32> to vector<1x8x32xf32>
    tpu.vector_store %arg20[%c0_83, %c0_84, %c0_85], %190 {strides = array<i32>} : memref<1x8x32xf32, #tpu.memory_space<vmem>>, vector<1x8x32xf32>,
    return
  }
  func.func @transform_0(%arg0: i32, %arg1: i32) -> (i32, i32, i32) {
    %c0_i32 = arith.constant 0 : i32
    %c0_i32_0 = arith.constant 0 : i32
    return %arg0, %arg1, %c0_i32 : i32, i32, i32
  }
  func.func @transform_1(%arg0: i32, %arg1: i32) -> (i32, i32, i32) {
    %c0_i32 = arith.constant 0 : i32
    %c0_i32_0 = arith.constant 0 : i32
    %c0_i32_1 = arith.constant 0 : i32
    return %arg0, %c0_i32, %c0_i32_0 : i32, i32, i32
  }
  func.func @transform_2(%arg0: i32, %arg1: i32) -> (i32, i32) {
    %c0_i32 = arith.constant 0 : i32
    %c0_i32_0 = arith.constant 0 : i32
    %c0_i32_1 = arith.constant 0 : i32
    return %c0_i32, %c0_i32_0 : i32, i32
  }
  func.func @transform_3(%arg0: i32, %arg1: i32) -> (i32, i32) {
    %c0_i32 = arith.constant 0 : i32
    %c0_i32_0 = arith.constant 0 : i32
    %c0_i32_1 = arith.constant 0 : i32
    return %c0_i32, %c0_i32_0 : i32, i32
  }
  func.func @transform_4(%arg0: i32, %arg1: i32) -> (i32, i32) {
    %c0_i32 = arith.constant 0 : i32
    %c0_i32_0 = arith.constant 0 : i32
    %c0_i32_1 = arith.constant 0 : i32
    return %c0_i32, %c0_i32_0 : i32, i32
  }
  func.func @transform_5(%arg0: i32, %arg1: i32) -> (i32, i32) {
    %c0_i32 = arith.constant 0 : i32
    %c0_i32_0 = arith.constant 0 : i32
    %c0_i32_1 = arith.constant 0 : i32
    return %c0_i32, %c0_i32_0 : i32, i32
  }
  func.func @transform_6(%arg0: i32, %arg1: i32) -> (i32, i32) {
    %c0_i32 = arith.constant 0 : i32
    %c0_i32_0 = arith.constant 0 : i32
    %c0_i32_1 = arith.constant 0 : i32
    return %c0_i32, %c0_i32_0 : i32, i32
  }
  func.func @transform_7(%arg0: i32, %arg1: i32) -> (i32, i32) {
    %c0_i32 = arith.constant 0 : i32
    %c0_i32_0 = arith.constant 0 : i32
    %c0_i32_1 = arith.constant 0 : i32
    return %c0_i32, %c0_i32_0 : i32, i32
  }
  func.func @transform_8(%arg0: i32, %arg1: i32) -> (i32, i32) {
    %c0_i32 = arith.constant 0 : i32
    %c0_i32_0 = arith.constant 0 : i32
    %c0_i32_1 = arith.constant 0 : i32
    return %c0_i32, %c0_i32_0 : i32, i32
  }
  func.func @transform_9(%arg0: i32, %arg1: i32) -> (i32, i32) {
    %c0_i32 = arith.constant 0 : i32
    %c0_i32_0 = arith.constant 0 : i32
    %c0_i32_1 = arith.constant 0 : i32
    return %c0_i32, %c0_i32_0 : i32, i32
  }
  func.func @transform_10(%arg0: i32, %arg1: i32) -> (i32, i32) {
    %c0_i32 = arith.constant 0 : i32
    %c0_i32_0 = arith.constant 0 : i32
    %c0_i32_1 = arith.constant 0 : i32
    return %c0_i32, %c0_i32_0 : i32, i32
  }
  func.func @transform_11(%arg0: i32, %arg1: i32) -> (i32, i32) {
    %c0_i32 = arith.constant 0 : i32
    %c0_i32_0 = arith.constant 0 : i32
    %c0_i32_1 = arith.constant 0 : i32
    return %c0_i32, %c0_i32_0 : i32, i32
  }
  func.func @transform_12(%arg0: i32, %arg1: i32) -> (i32, i32) {
    %c0_i32 = arith.constant 0 : i32
    %c0_i32_0 = arith.constant 0 : i32
    %c0_i32_1 = arith.constant 0 : i32
    return %c0_i32, %c0_i32_0 : i32, i32
  }
  func.func @transform_13(%arg0: i32, %arg1: i32) -> (i32, i32) {
    %c0_i32 = arith.constant 0 : i32
    %c0_i32_0 = arith.constant 0 : i32
    %c0_i32_1 = arith.constant 0 : i32
    return %c0_i32, %c0_i32_0 : i32, i32
  }
  func.func @transform_14(%arg0: i32, %arg1: i32) -> (i32, i32) {
    %c0_i32 = arith.constant 0 : i32
    %c0_i32_0 = arith.constant 0 : i32
    %c0_i32_1 = arith.constant 0 : i32
    return %c0_i32, %c0_i32_0 : i32, i32
  }
  func.func @transform_15(%arg0: i32, %arg1: i32) -> (i32, i32) {
    %c0_i32 = arith.constant 0 : i32
    %c0_i32_0 = arith.constant 0 : i32
    %c0_i32_1 = arith.constant 0 : i32
    return %c0_i32, %c0_i32_0 : i32, i32
  }
  func.func @transform_16(%arg0: i32, %arg1: i32) -> (i32, i32) {
    %c0_i32 = arith.constant 0 : i32
    %c0_i32_0 = arith.constant 0 : i32
    %c0_i32_1 = arith.constant 0 : i32
    return %c0_i32, %c0_i32_0 : i32, i32
  }
  func.func @transform_17(%arg0: i32, %arg1: i32) -> (i32, i32) {
    %c0_i32 = arith.constant 0 : i32
    %c0_i32_0 = arith.constant 0 : i32
    %c0_i32_1 = arith.constant 0 : i32
    return %c0_i32, %c0_i32_0 : i32, i32
  }
  func.func @transform_18(%arg0: i32, %arg1: i32) -> (i32, i32, i32) {
    %c0_i32 = arith.constant 0 : i32
    %c0_i32_0 = arith.constant 0 : i32
    return %arg0, %arg1, %c0_i32 : i32, i32, i32
  }
}

</mosaic_0001>

<bundles_post_ra>
// kernel: tpu_custom_call.1
= control target key start
LH: loop header
LB: loop body
LE: loop exit
PB: predicated region body
PF: predicated region fallthrough
CT: control target
= control target key end

     0   :  { %s3033_s0 = inlined_call_operand.vmem [shape: f32[2,8,32], index: 0, kind: input, shape index: {}]   ;;  %s3034_s1 = inlined_call_operand.vmem [shape: f32[2,8,32], index: 1, kind: input, shape index: {}]   ;;  %s3035_s2 = inlined_call_operand.vmem [shape: f32[32,32], index: 2, kind: input, shape index: {}]   ;;  %s3036_s3 = inlined_call_operand.vmem [shape: f32[1,32], index: 3, kind: input, shape index: {}]   ;;  %s3037_s4 = inlined_call_operand.vmem [shape: f32[32,64], index: 4, kind: input, shape index: {}]   ;;  %s3038_s5 = inlined_call_operand.vmem [shape: f32[1,64], index: 5, kind: input, shape index: {}]   ;;  %s3039_s6 = inlined_call_operand.vmem [shape: f32[32,32], index: 6, kind: input, shape index: {}]   ;;  %s3040_s7 = inlined_call_operand.vmem [shape: f32[1,32], index: 7, kind: input, shape index: {}]   ;;  %s3041_s8 = inlined_call_operand.vmem [shape: f32[1,32], index: 8, kind: input, shape index: {}]   ;;  %s3042_s9 = inlined_call_operand.vmem [shape: f32[1,32], index: 9, kind: input, shape index: {}]   ;;  %s3043_s10 = inlined_call_operand.vmem [shape: f32[1,32], index: 10, kind: input, shape index: {}]   ;;  %s3044_s11 = inlined_call_operand.vmem [shape: f32[1,32], index: 11, kind: input, shape index: {}]   ;;  %s3045_s12 = inlined_call_operand.vmem [shape: f32[1,32], index: 12, kind: input, shape index: {}]   ;;  %s3046_s13 = inlined_call_operand.vmem [shape: f32[1,32], index: 13, kind: input, shape index: {}]   ;;  %s3047_s14 = inlined_call_operand.vmem [shape: f32[32,128], index: 14, kind: input, shape index: {}]   ;;  %s3048_s15 = inlined_call_operand.vmem [shape: f32[1,128], index: 15, kind: input, shape index: {}]   ;;  %s3049_s16 = inlined_call_operand.vmem [shape: f32[128,32], index: 16, kind: input, shape index: {}]   ;;  %s3050_s17 = inlined_call_operand.vmem [shape: f32[1,32], index: 17, kind: input, shape index: {}]   ;;  %s3051_s18 = inlined_call_operand.hbm [shape: f32[2,8,32], index: 18, kind: output, shape index: {}]  }
   0x1   :  { %3059 = sst [smem:[#allocation9_spill]] %s3033_s0 }
   0x2   :  { %3060 = sst [smem:[#allocation10_spill]] %s3034_s1 }
   0x3   :  { %3061 = sst [smem:[#allocation11_spill]] %s3035_s2 }
   0x4   :  { %3062 = sst [smem:[#allocation12_spill]] %s3036_s3 }
   0x5   :  { %3063 = sst [smem:[#allocation13_spill]] %s3037_s4 }
   0x6   :  { %3064 = sst [smem:[#allocation14_spill]] %s3038_s5 }
   0x7   :  { %3065 = sst [smem:[#allocation15_spill]] %s3050_s17 }
   0x8   :  { %3066 = sst [smem:[#allocation16_spill]] %s3051_s18 }
   0x9   :  { %23 = vsyncpa [#allocation3], 0 }
   0xa   :  { %25 = vsyncpa [#allocation3 + $0x1], 0  ;;  %s2671_s27 = smov 0   ;;  %s2673_s28 = smov 0  }
   0xb   :  { %s2675_s29 = smov 0   ;;  %s2677_s30 = smov 0  }
   0xc   :  { %s2679_s0 = smov 0   ;;  %s2681_s19 = smov 0  }
   0xd LB: > { %3067 = sst [smem:[#allocation5_spill]] %s2543_s27  ;;  %s2125_s1 = sadd.s32 4294967295, %s2563_s19   ;;  %s2563_s19 = sphi %s2681_s19, %s31_s19   ;;  %s2559_s0 = sphi %s2679_s0, %s3085_s0   ;;  %s2555_s30 = sphi %s2677_s30, %s3084_s30   ;;  %s2551_s29 = sphi %s2675_s29, %s3088_s29   ;;  %s2547_s28 = sphi %s2673_s28, %s3087_s28   ;;  %s2543_s27 = sphi %s2671_s27, %s3086_s27  }
   0xe   : > { %3068 = sst [smem:[#allocation6_spill]] %s2559_s0  ;;  %s2126_s20 = sadd.s32 4294967294, %s2563_s19  }
   0xf   : > { %s43_s21 = sadd.s32 1, %s2559_s0  ;;  %s442_s22 = sadd.s32 1, %s2551_s29 }
  0x10   : > { %p45_p0 = scmp.ge.s32.totalorder %s43_s21, 2  ;;  %p452_p1 = scmp.ne.s32.totalorder %s2551_s29, %s2547_s28 }
  0x11   : > { %p453_p2 = scmp.eq.s32.totalorder %s2125_s1, 1  ;;  %p458_p3 = scmp.ne.s32.totalorder %s2547_s28, %s2543_s27 }
  0x12   : > { %s3090_s21 = smov (%p45_p0, %s43_s21), 0  ;;  %p459_p5 = scmp.eq.s32.totalorder %s2126_s20, 1 }
  0x13   : > { %3069 = sst [smem:[#allocation7_spill]] %s3090_s21  ;;  %p2711_p4 = por %p453_p2, %p452_p1 }
  0x14   : > { %s437_s23 = ssub.s32 %s2559_s0, %s3090_s21  ;;  %p2129_p6 = scmp.ge.s32.totalorder %s2563_s19, 1 }
  0x15   : > { %s3070_s2 = scalar_select %p2711_p4, 1, 0 }
  0x16   : > { %p440_p7 = scmp.eq.s32.totalorder %s437_s23, 0  ;;  %p2718_p8 = por %p459_p5, %p458_p3 }
  0x17   : > { %3071 = sst [smem:[#allocation8_spill]] %s3070_s2  ;;  %p542_p9 = scmp.lt.s32.totalorder %s2563_s19, 3 }
  0x18   : > { %s2724_s25 = scalar_select %p440_p7, %s2551_s29, %s442_s22  }
  0x19   : > { %p543_p10 = pnand %p2129_p6, %p542_p9 }
  0x1a   : > { %p602_p11 = scmp.lt.s32.totalorder (!%p543_p10), %s2555_s30, 1  ;;  %vm617_vm0 = vcmask (!%p543_p10), 261120   ;;  %s3073_s21 = sld [smem:[#allocation9_spill]] (!%p543_p10)  ;;  %v2565_v17 = vmov (!%p543_p10), 0.0|0.0   ;;  %vm2566_vm1 = vmmov (!%p543_p10), 0   ;;  %v2567_v21 = vmov (!%p543_p10), 0.0  }
  0x1b   : > { %546 = sbr.rel (%p543_p10) target bundleno = 4122 (0x101a), region = 92  ;;  %s3074_s17 = sld [smem:[#allocation10_spill]] (!%p543_p10)  ;;  %2352 = vmatprep.subr.bf16.mxu0 (!%p543_p10), %v2565_v17  ;;  %2232 = vmatprep.mubr.msk.f32.mxu0 (!%p543_p10), %vm2566_vm1, %v2567_v21  ;;  %v2133_v29 = vld [vmem:[%s3041_s8] ss:$0 sm:$0xff] (!%p543_p10)  ;;  %vm844_vm2 = vcmask (!%p543_p10), 64512  }
  0x1c   : > { %s3075_s27 = sld [smem:[#allocation11_spill]] (!%p543_p10)  ;;  %2261 = vmatprep.subr.mxu1 (!%p543_p10), %v2567_v21  ;;  %2263 = vmatprep.mubr.msk.f32.mxu1 (!%p543_p10), %vm2566_vm1, %v2567_v21  ;;  %s3077_s4 = sld [smem:[#allocation13_spill]] (!%p543_p10)  ;;  %v2134_v33 = vld [vmem:[%s3042_s9] ss:$0 sm:$0xff] (!%p543_p10) }
  0x1d   : > { %v2135_v41 = vld [vmem:[%s3045_s12] ss:$0 sm:$0xff] (!%p543_p10)  ;;  %s3078_s3 = sld [smem:[#allocation12_spill]] (!%p543_p10)  ;;  %s3079_s5 = sld [smem:[#allocation14_spill]] (!%p543_p10) }
  0x1e   : > { %v2136_v44 = vld [vmem:[%s3046_s13] ss:$0 sm:$0xff] (!%p543_p10)  ;;  %s2568_s23 = smov (!%p543_p10), 120   ;;  %s2570_s18 = smov (!%p543_p10), 112  }
  0x1f   : > { %s2573_s20 = smov (!%p543_p10), 104  }
  0x22   : > { %s603_s26 = scalar_select %p602_p11, %s2555_s30, 1  ;;  %v675_v14 = vld [vmem:[%s3075_s27] sm:$0xff]  ;;  %v760_v32 = vld [vmem:[%s3077_s4 + $0x8] sm:$0xff]  ;;  %v761_v39 = vld [vmem:[%s3077_s4 + $0x10] sm:$0xff] }
  0x23   : > { %v759_v31 = vld [vmem:[%s3077_s4] sm:$0xff]  ;;  %v762_v40 = vld [vmem:[%s3077_s4 + $0x18] sm:$0xff]  ;;  %s3082_s4 = sld [smem:[#allocation16_spill]] }
  0x24   : > { %s2131_s1 = sshll.u32 %s603_s26, 3  ;;  %v2359_v36 = vpack.c.bf16 %v760_v32, %v759_v31  ;;  %v2362_v42 = vpack.c.bf16 %v762_v40, %v761_v39  ;;  %v2137_v48 = vld [vmem:[%s3078_s3] ss:$0 sm:$0xff] }
  0x25   : > { %s608_s0 = scalar_lea.vmem %s3073_s21, %s2131_s1  ;;  %s612_s2 = scalar_lea.vmem %s3074_s17, %s2131_s1  ;;  %v2139_v49 = vld [vmem:[%s3079_s5] ss:$0 sm:$0xff] }
  0x26   : > { %v2734_v0 = vld [vmem:[%s608_s0] sm:$0xff]  ;;  %s3076_s21 = smov %s3075_s27  ;;  %s2569_s17 = smov 96  }
  0x27   : > { %v614_v1 = vld [vmem:[%s612_s2] sm:$0xff]  ;;  %v618_v2 = vsel %vm617_vm0, %v2734_v0, 0.0  ;;  %v676_v15 = vld [vmem:[%s3076_s21 + $0x8] sm:$0xff]  ;;  %v677_v18 = vld [vmem:[%s3076_s21 + $0x10] sm:$0xff]  ;;  %s2571_s27 = smov 88   ;;  %s2572_s1 = smov 80  }
  0x28   : > { %619 = vadd.xlane.f32.xlu0 %v618_v2  ;;  %v648_v3 = vsel %vm617_vm0, %v614_v1, 0.0  ;;  %v2353_v16 = vpack.c.bf16 %v676_v15, %v675_v14  ;;  %v678_v19 = vld [vmem:[%s3076_s21 + $0x18] sm:$0xff] }
  0x29   : > { %v2356_v20 = vpack.c.bf16 %v678_v19, %v677_v18 }
  0x2a   : > { %2354 = vmatpush3.bf16.msra.mxu0 %v2353_v16  ;;  %v1174_v16 = vld [vmem:[%s3039_s6 + $0x8] sm:$0xff] }
  0x2b   : > { %2355 = vmatprep.subr.bf16.mxu0 %v2565_v17 }
  0x2c   : > { %649 = vadd.xlane.f32.xlu0 %v648_v3 }
  0x2e   : > { %2357 = vmatpush3.bf16.msra.mxu0 %v2356_v20 }
  0x2f   : > { %2358 = vmatprep.subr.bf16.mxu0 %v2565_v17 }
  0xb5   : > { %v620_v4 = vpop.xlane.xlu0 %619 }
  0xb6   : > { %v622_v5 = vmul.f32 0.03125, %v620_v4 }
  0xb8   : > { %v623_v6 = vsub.f32 %v2734_v0, %v622_v5 }
  0xb9   : > { %v650_v7 = vpop.xlane.xlu0 %649 }
  0xba   : > { %v651_v8 = vmul.f32 0.03125, %v650_v7  ;;  %v624_v9 = vmul.f32 %v623_v6, %v623_v6 }
  0xbc   : > { %v652_v10 = vsub.f32 %v614_v1, %v651_v8  ;;  %v625_v11 = vsel %vm617_vm0, %v624_v9, 0.0 }
  0xbd   : > { %626 = vadd.xlane.f32.xlu1 %v625_v11 }
  0xbe   : > { %v653_v12 = vmul.f32 %v652_v10, %v652_v10 }
  0xc0   : > { %v654_v13 = vsel %vm617_vm0, %v653_v12, 0.0 }
  0xc1   : > { %655 = vadd.xlane.f32.xlu1 %v654_v13 }
 0x14a   : > { %v627_v22 = vpop.xlane.xlu1 %626 }
 0x14b   : > { %v628_v23 = vmul.f32 0.03125, %v627_v22 }
 0x14d   : > { %v629_v24 = vadd.f32 1e-05, %v628_v23  ;;  %v1008_v23 = vld [vmem:[%s3039_s6] sm:$0xff] }
 0x14e   : > { %v656_v25 = vpop.xlane.xlu1 %655 }
 0x14f   : > { %2459 = vrsqrt.f32 %v629_v24  ;;  %v657_v26 = vmul.f32 0.03125, %v656_v25 }
 0x151   : > { %v658_v27 = vadd.f32 1e-05, %v657_v26 }
 0x153   : > { %2461 = vrsqrt.f32 %v658_v27 }
 0x159   : > { %v2460_v28 = vpop.eup %2459 }
 0x15a   : > { %v631_v30 = vmul.f32 %v2460_v28, %v623_v6 }
 0x15c   : > { %v638_v34 = vmul.f32 %v2133_v29, %v631_v30 }
 0x15d   : > { %v2462_v35 = vpop.eup %2461 }
 0x15e   : > { %v660_v37 = vmul.f32 %v2462_v35, %v652_v10  ;;  %v645_v38 = vadd.f32 %v2134_v33, %v638_v34 }
 0x160   : > { %2233 = vmatmul.mubr.msk.f32.vlgmr.msra.gmra.mrb[0].mxu0 %vm617_vm0, %v645_v38  ;;  %v667_v43 = vmul.f32 %v2135_v41, %v660_v37 }
 0x161   : > { %2360 = vmatpush3.bf16.msra.mxu0 %v2359_v36  ;;  %2243 = vmatprep.mubr.msk.f32.mxu0 %vm2566_vm1, %v2567_v21 }
 0x162   : > { %2361 = vmatprep.subr.bf16.mxu0 %v2565_v17  ;;  %v674_v45 = vadd.f32 %v2136_v44, %v667_v43 }
 0x165   : > { %2363 = vmatpush3.bf16.msra.mxu0 %v2362_v42 }
 0x166   : > { %2246 = vmatprep.subr.mxu0 %v2567_v21 }
 0x168   : > { %2244 = vmatmul.mubr.msk.f32.vlgmr.msra.gmra.mrb[2].mxu0 %vm617_vm0, %v674_v45 }
 0x169   : > { %2248 = vmatprep.mubr.msk.f32.mxu0 %vm2566_vm1, %v2567_v21 }
 0x233   : > { %v755_v46 = vpop.f32.mrb[0].mxu0 }
 0x234   : > { %v2234_v47 = vpop.f32.mrb[1].mxu0  ;;  %v756_v50 = vadd.f32 %v2137_v48, %v755_v46 }
 0x235   : > { %v1486_v47 = vld [vmem:[%s3039_s6 + $0x10] sm:$0xff] }
 0x236   : > { %v2805_v54 = vmul.f32 0.35355338, %v756_v50 }
 0x23b   : > { %v839_v51 = vpop.f32.mrb[2].mxu0 }
 0x23c   : > { %v2800_v52 = vadd.f32 %v2139_v49, %v839_v51  ;;  %v2245_v53 = vpop.f32.mrb[3].mxu0 }
 0x23e   : > { %1011 = vrot.lane.b32.xlu1 %v2800_v52, %s2568_s23  ;;  %2247 = vmatpush3.xpose.msk.msra.mxu0 %vm844_vm2, %v2800_v52 }
 0x23f   : > { %2251 = vmatprep.subr.mxu0 %v2567_v21 }
 0x241   : > { %2249 = vmatmul.mubr.msk.f32.vlgmr.msra.gmra.mrb[4].mxu0 %vm844_vm2, %v2805_v54 }
 0x242   : > { %2253 = vmatprep.mubr.msk.f32.mxu0 %vm2566_vm1, %v2567_v21 }
 0x2b0   : > { %v1012_v1 = vpop.permute.xlu1 %1011 }
 0x314   : > { %v917_v55 = vpop.f32.mrb[4].mxu0 }
 0x315   : > { %v2250_v56 = vpop.f32.mrb[5].mxu0  ;;  %v921_v57 = vsel %vm844_vm2, %v917_v55, -inf }
 0x316   : > { %922 = vmax.xlane.f32.xlu0 %v921_v57 }
 0x32c   : > { %932 = vrot.lane.b32.xlu0 %v2800_v52, %s2569_s17 }
 0x3a3   : > { %v923_v58 = vpop.xlane.xlu0 %922 }
 0x3a4   : > { %v924_v59 = vsub.f32 %v917_v55, %v923_v58 }
 0x3a6   : > { %v925_v60 = vmul.f32 1.442695, %v924_v59  ;;  %v1726_v59 = vld [vmem:[%s3039_s6 + $0x18] sm:$0xff] }
 0x3a7   : > { %v933_v61 = vpop.permute.xlu0 %932 }
 0x3a8   : > { %2463 = vpow2.f32 %v925_v60  ;;  %2252 = vmatpush3.msra.mxu0 %v933_v61 }
 0x3a9   : > { %2256 = vmatprep.subr.mxu0 %v2567_v21 }
 0x3b2   : > { %v2464_v62 = vpop.eup %2463 }
 0x3b3   : > { %v927_v63 = vsel %vm844_vm2, %v2464_v62, 0.0 }
 0x3b4   : > { %928 = vadd.xlane.f32.xlu1 %v927_v63 }
 0x3c5   : > { %1009 = vrot.lane.b32.xlu1 %v2805_v54, %s2568_s23 }
 0x441   : > { %v929_v2 = vpop.xlane.xlu1 %928 }
 0x442   : > { %2465 = vrcp.f32 %v929_v2 }
 0x445   : > { %v1010_v5 = vpop.permute.xlu1 %1009 }
 0x44c   : > { %v2466_v3 = vpop.eup %2465 }
 0x44d   : > { %v931_v4 = vmul.f32 %v2466_v3, %v2464_v62 }
 0x44f   : > { %2254 = vmatmul.mubr.msk.f32.vlgmr.msra.gmra.mrb[6].mxu0 %vm844_vm2, %v931_v4 }
 0x450   : > { %2257 = vmatpush3.xpose.msk.msra.mxu0 %vm844_vm2, %v1012_v1  ;;  %2258 = vmatprep.mubr.msk.f32.mxu0 %vm2566_vm1, %v2567_v21 }
 0x451   : > { %2266 = vmatprep.subr.mxu0 %v2567_v21 }
 0x453   : > { %2259 = vmatmul.mubr.msk.f32.vlgmr.msra.gmra.mrb[8].mxu0 %vm844_vm2, %v1010_v5 }
 0x454   : > { %2268 = vmatprep.mubr.msk.f32.mxu0 %vm2566_vm1, %v2567_v21  ;;  %2267 = vmatpush3.msra.mxu0 %v1174_v16  ;;  %v1839_v16 = vld [vmem:[%s3047_s14] sm:$0xff] }
 0x455   : > { %2276 = vmatprep.subr.mxu0 %v2567_v21 }
 0x522   : > { %v1004_v6 = vpop.f32.mrb[6].mxu0 }
 0x523   : > { %v2255_v7 = vpop.f32.mrb[7].mxu0 }
 0x526   : > { %v1083_v8 = vpop.f32.mrb[8].mxu0 }
 0x527   : > { %v2260_v9 = vpop.f32.mrb[9].mxu0  ;;  %v1087_v10 = vsel %vm844_vm2, %v1083_v8, -inf }
 0x528   : > { %1088 = vmax.xlane.f32.xlu1 %v1087_v10 }
 0x539   : > { %1323 = vrot.lane.b32.xlu1 %v2800_v52, %s2570_s18 }
 0x53d   : > { %1321 = vrot.lane.b32.xlu1 %v2805_v54, %s2570_s18  ;;  %s2574_s18 = smov 72  }
 0x5b5   : > { %v1089_v11 = vpop.xlane.xlu1 %1088 }
 0x5b6   : > { %v1090_v12 = vsub.f32 %v1083_v8, %v1089_v11  ;;  %v2157_v8 = vld [vmem:[%s3040_s7] ss:$0 sm:$0xff] }
 0x5b8   : > { %v1091_v13 = vmul.f32 1.442695, %v1090_v12 }
 0x5b9   : > { %v1324_v24 = vpop.permute.xlu1 %1323 }
 0x5ba   : > { %2467 = vpow2.f32 %v1091_v13 }
 0x5bd   : > { %v1322_v27 = vpop.permute.xlu1 %1321 }
 0x5c4   : > { %v2468_v14 = vpop.eup %2467 }
 0x5c5   : > { %v1093_v15 = vsel %vm844_vm2, %v2468_v14, 0.0 }
 0x5c6   : > { %1094 = vadd.xlane.f32.xlu0 %v1093_v15 }
 0x5dc   : > { %1098 = vrot.lane.b32.xlu0 %v2800_v52, %s2571_s27  ;;  %s599_s27 = sand.u32 1, %s2547_s28  }
 0x5dd   : > { %s2130_s22 = sshll.u32 %s599_s27, 3  ;;  %s2028_s2 = scalar_lea.sflag [#allocation3], %s599_s27 }
 0x5de   : > { %s601_s23 = scalar_lea.vmem [#allocation2], %s2130_s22  ;;  %s2575_s22 = smov [#allocation2]  }
 0x5df   : > { %s2042_s17 = sshll.u32 %s601_s23, 4  ;;  %s2489_s26 = sshll.u32 %s2575_s22, 4  ;;  %s2987_s17 = int_to_ptr.vmem [resolvable:$true] %s2042_s17  ;;  %s2490_s26 = int_to_ptr.vmem [resolvable:$false] %s2489_s26 }
 0x5e0   : > { %p2492_p1 = scmp.lt.s32.totalorder %s2987_s17, %s2490_s26 }
 0x653   : > { %v1095_v18 = vpop.xlane.xlu0 %1094 }
 0x654   : > { %2469 = vrcp.f32 %v1095_v18 }
 0x657   : > { %v1099_v19 = vpop.permute.xlu0 %1098 }
 0x658   : > { %2262 = vmatpush3.msra.mxu1 %v1099_v19  ;;  %v1841_v19 = vld [vmem:[%s3047_s14 + $0x10] sm:$0xff] }
 0x659   : > { %2271 = vmatprep.subr.mxu1 %v2567_v21 }
 0x65e   : > { %v2470_v20 = vpop.eup %2469 }
 0x65f   : > { %v1097_v22 = vmul.f32 %v2470_v20, %v2468_v14  ;;  %v1842_v20 = vld [vmem:[%s3047_s14 + $0x18] sm:$0xff] }
 0x661   : > { %2264 = vmatmul.mubr.msk.f32.vlgmr.msra.gmra.mrb[0].mxu1 %vm844_vm2, %v1097_v22  ;;  %v2368_v22 = vpack.c.bf16 %v1842_v20, %v1841_v19 }
 0x662   : > { %2272 = vmatpush3.msra.mxu1 %v1008_v23  ;;  %2273 = vmatprep.mubr.msk.f32.mxu1 %vm2566_vm1, %v2567_v21 }
 0x663   : > { %2281 = vmatprep.subr.mxu1 %v2567_v21 }
 0x665   : > { %2274 = vmatmul.mubr.msk.f32.vlgmr.msra.gmra.mrb[2].mxu1 %vm844_vm2, %v1004_v6 }
 0x666   : > { %2283 = vmatprep.mubr.msk.f32.mxu1 %vm2566_vm1, %v2567_v21 }
 0x734   : > { %v1170_v25 = vpop.f32.mrb[0].mxu1 }
 0x735   : > { %v2265_v26 = vpop.f32.mrb[1].mxu1  ;;  %2269 = vmatmul.mubr.msk.f32.vlgmr.msra.gmra.mrb[10].mxu0 %vm844_vm2, %v1170_v25 }
 0x736   : > { %2277 = vmatpush3.xpose.msk.msra.mxu0 %vm844_vm2, %v1324_v24  ;;  %2278 = vmatprep.mubr.msk.f32.mxu0 %vm2566_vm1, %v2567_v21 }
 0x737   : > { %2286 = vmatprep.subr.mxu0 %v2567_v21 }
 0x738   : > { %v1317_v28 = vpop.f32.mrb[2].mxu1 }
 0x739   : > { %v2275_v29 = vpop.f32.mrb[3].mxu1  ;;  %2279 = vmatmul.mubr.msk.f32.vlgmr.msra.gmra.mrb[12].mxu0 %vm844_vm2, %v1322_v27  ;;  %v2158_v27 = vld [vmem:[%s3043_s10] ss:$0 sm:$0xff] }
 0x73a   : > { %2288 = vmatprep.mubr.msk.f32.mxu0 %vm2566_vm1, %v2567_v21  ;;  %2287 = vmatpush3.msra.mxu0 %v1486_v47  ;;  %v2159_v29 = vld [vmem:[%s3044_s11] ss:$0 sm:$0xff]  ;;  %v1941_v47 = vld [vmem:[%s3049_s16 + $0x50] sm:$0xff] }
 0x73b   : > { %2296 = vmatprep.subr.mxu0 %v2567_v21 }
 0x808   : > { %v1244_v30 = vpop.f32.mrb[10].mxu0 }
 0x809   : > { %v1318_v31 = vadd.f32 %v1317_v28, %v1244_v30  ;;  %v2270_v32 = vpop.f32.mrb[11].mxu0 }
 0x80a   : > { %v1931_v32 = vld [vmem:[%s3049_s16] sm:$0xff] }
 0x80c   : > { %v1395_v33 = vpop.f32.mrb[12].mxu0 }
 0x80d   : > { %v2280_v34 = vpop.f32.mrb[13].mxu0  ;;  %v1399_v35 = vsel %vm844_vm2, %v1395_v33, -inf }
 0x80e   : > { %1400 = vmax.xlane.f32.xlu0 %v1399_v35  ;;  %v1933_v35 = vld [vmem:[%s3049_s16 + $0x10] sm:$0xff] }
 0x824   : > { %1410 = vrot.lane.b32.xlu0 %v2800_v52, %s2572_s1  ;;  %s3081_s1 = sld [smem:[#allocation15_spill]] }
 0x828   : > { %1561 = vrot.lane.b32.xlu0 %v2805_v54, %s2573_s20 }
 0x89b   : > { %v1401_v36 = vpop.xlane.xlu0 %1400 }
 0x89c   : > { %v1402_v37 = vsub.f32 %v1395_v33, %v1401_v36  ;;  %v1932_v33 = vld [vmem:[%s3049_s16 + $0x8] sm:$0xff]  ;;  %v1934_v36 = vld [vmem:[%s3049_s16 + $0x18] sm:$0xff] }
 0x89d   : > { %v2371_v34 = vpack.c.bf16 %v1932_v33, %v1931_v32 }
 0x89e   : > { %v1403_v38 = vmul.f32 1.442695, %v1402_v37  ;;  %v2374_v37 = vpack.c.bf16 %v1934_v36, %v1933_v35 }
 0x89f   : > { %v1411_v39 = vpop.permute.xlu0 %1410 }
 0x8a0   : > { %2471 = vpow2.f32 %v1403_v38  ;;  %2282 = vmatpush3.msra.mxu1 %v1411_v39  ;;  %v1935_v38 = vld [vmem:[%s3049_s16 + $0x20] sm:$0xff]  ;;  %v1936_v39 = vld [vmem:[%s3049_s16 + $0x28] sm:$0xff] }
 0x8a1   : > { %2291 = vmatprep.subr.mxu1 %v2567_v21 }
 0x8a3   : > { %v1562_v46 = vpop.permute.xlu0 %1561 }
 0x8aa   : > { %v2472_v40 = vpop.eup %2471 }
 0x8ab   : > { %v1405_v41 = vsel %vm844_vm2, %v2472_v40, 0.0 }
 0x8ac   : > { %1406 = vadd.xlane.f32.xlu1 %v1405_v41  ;;  %v1937_v41 = vld [vmem:[%s3049_s16 + $0x30] sm:$0xff] }
 0x8bd   : > { %1563 = vrot.lane.b32.xlu1 %v2800_v52, %s2573_s20  ;;  %s2165_s20 = sshll.u32 %s2555_s30, 7  ;;  %s2485_s30 = scalar_lea.vmem %s2987_s17, 128 }
 0x8be   : > { %s2985_s5 = scalar_lea.hbm %s3082_s4, %s2165_s20  ;;  %p2486_p12 = scmp.ne.s32.totalorder %s2987_s17, %s2485_s30 }
 0x8c0   : > { %p2487_p13 = pnand %p2486_p12, %p2711_p4 }
 0x8c2   : > { %p2488_p0 = pneg %p2487_p13 }
 0x939   : > { %v1407_v42 = vpop.xlane.xlu1 %1406 }
 0x93a   : > { %2473 = vrcp.f32 %v1407_v42  ;;  %v1938_v42 = vld [vmem:[%s3049_s16 + $0x38] sm:$0xff] }
 0x93d   : > { %v1564_v45 = vpop.permute.xlu1 %1563 }
 0x944   : > { %v2474_v43 = vpop.eup %2473 }
 0x945   : > { %v1409_v44 = vmul.f32 %v2474_v43, %v2472_v40  ;;  %v2377_v40 = vpack.c.bf16 %v1936_v39, %v1935_v38  ;;  %v2380_v43 = vpack.c.bf16 %v1938_v42, %v1937_v41 }
 0x947   : > { %2284 = vmatmul.mubr.msk.f32.vlgmr.msra.gmra.mrb[4].mxu1 %vm844_vm2, %v1409_v44  ;;  %v1939_v44 = vld [vmem:[%s3049_s16 + $0x40] sm:$0xff] }
 0x948   : > { %2292 = vmatpush3.xpose.msk.msra.mxu1 %vm844_vm2, %v1564_v45  ;;  %2293 = vmatprep.mubr.msk.f32.mxu1 %vm2566_vm1, %v2567_v21  ;;  %v1940_v45 = vld [vmem:[%s3049_s16 + $0x48] sm:$0xff] }
 0x949   : > { %2301 = vmatprep.subr.mxu1 %v2567_v21 }
 0x94b   : > { %2294 = vmatmul.mubr.msk.f32.vlgmr.msra.gmra.mrb[6].mxu1 %vm844_vm2, %v1562_v46  ;;  %v2383_v46 = vpack.c.bf16 %v1940_v45, %v1939_v44 }
 0x94c   : > { %2303 = vmatprep.mubr.msk.f32.mxu1 %vm2566_vm1, %v2567_v21  ;;  %2302 = vmatpush3.msra.mxu1 %v1726_v59 }
 0x94d   : > { %2370 = vmatprep.subr.bf16.mxu1 %v2565_v17 }
 0xa1a   : > { %v1482_v48 = vpop.f32.mrb[4].mxu1 }
 0xa1b   : > { %v2285_v49 = vpop.f32.mrb[5].mxu1  ;;  %2289 = vmatmul.mubr.msk.f32.vlgmr.msra.gmra.mrb[14].mxu0 %vm844_vm2, %v1482_v48  ;;  %v1942_v48 = vld [vmem:[%s3049_s16 + $0x58] sm:$0xff] }
 0xa1c   : > { %2298 = vmatprep.mubr.msk.f32.mxu0 %vm2566_vm1, %v2567_v21  ;;  %v2386_v49 = vpack.c.bf16 %v1942_v48, %v1941_v47 }
 0xa1e   : > { %v1635_v50 = vpop.f32.mrb[6].mxu1 }
 0xa1f   : > { %v2295_v51 = vpop.f32.mrb[7].mxu1  ;;  %v1639_v53 = vsel %vm844_vm2, %v1635_v50, -inf }
 0xa20   : > { %1640 = vmax.xlane.f32.xlu1 %v1639_v53  ;;  %v1944_v51 = vld [vmem:[%s3049_s16 + $0x68] sm:$0xff] }
 0xaad   : > { %v1641_v54 = vpop.xlane.xlu1 %1640 }
 0xaae   : > { %v1642_v55 = vsub.f32 %v1635_v50, %v1641_v54  ;;  %v1943_v50 = vld [vmem:[%s3049_s16 + $0x60] sm:$0xff]  ;;  %v1945_v54 = vld [vmem:[%s3049_s16 + $0x70] sm:$0xff] }
 0xaaf   : > { %v2389_v53 = vpack.c.bf16 %v1944_v51, %v1943_v50 }
 0xab0   : > { %v1643_v56 = vmul.f32 1.442695, %v1642_v55  ;;  %v1946_v55 = vld [vmem:[%s3049_s16 + $0x78] sm:$0xff] }
 0xab2   : > { %2475 = vpow2.f32 %v1643_v56  ;;  %v2392_v56 = vpack.c.bf16 %v1946_v55, %v1945_v54 }
 0xabc   : > { %v2476_v57 = vpop.eup %2475 }
 0xabd   : > { %v1645_v58 = vsel %vm844_vm2, %v2476_v57, 0.0 }
 0xabe   : > { %1646 = vadd.xlane.f32.xlu0 %v1645_v58 }
 0xad4   : > { %1650 = vrot.lane.b32.xlu0 %v2800_v52, %s2574_s18 }
 0xaee   : > { %v1556_v60 = vpop.f32.mrb[14].mxu0 }
 0xaef   : > { %v1560_v61 = vadd.f32 %v1556_v60, %v1318_v31  ;;  %v2290_v62 = vpop.f32.mrb[15].mxu0 }
 0xb4b   : > { %v1647_v63 = vpop.xlane.xlu0 %1646 }
 0xb4c   : > { %2477 = vrcp.f32 %v1647_v63 }
 0xb4f   : > { %v1651_v1 = vpop.permute.xlu0 %1650 }
 0xb50   : > { %2297 = vmatpush3.msra.mxu0 %v1651_v1 }
 0xb51   : > { %2364 = vmatprep.subr.bf16.mxu0 %v2565_v17 }
 0xb56   : > { %v2478_v2 = vpop.eup %2477 }
 0xb57   : > { %v1649_v3 = vmul.f32 %v2478_v2, %v2476_v57  ;;  %v2160_v57 = vld [vmem:[%s3048_s15] ss:$0 sm:$0xff] }
 0xb59   : > { %2299 = vmatmul.mubr.msk.f32.vlgmr.msra.gmra.mrb[16].mxu0 %vm844_vm2, %v1649_v3 }
 0xb5a   : > { %2314 = vmatprep.mubr.msk.f32.mxu0 %vm2566_vm1, %v2567_v21 }
 0xc2c   : > { %v1722_v52 = vpop.f32.mrb[16].mxu0 }
 0xc2d   : > { %v2300_v4 = vpop.f32.mrb[17].mxu0  ;;  %2304 = vmatmul.mubr.msk.f32.vlgmr.msra.gmra.mrb[8].mxu1 %vm844_vm2, %v1722_v52  ;;  %v2163_v52 = vld [vmem:[%s3081_s1] ss:$0 sm:$0xff]  ;;  %s2491_s1 = scalar_lea.vmem %s2490_s26, 256 }
 0xc2e   : > { %2349 = vmatprep.mubr.msk.f32.mxu1 %vm2566_vm1, %v2567_v21  ;;  %2372 = vmatpush3.bf16.msra.mxu1 %v2371_v34  ;;  %p2493_p2 = scmp.lt.s32.totalorder %s2491_s1, %s2485_s30 }
 0xc2f   : > { %2373 = vmatprep.subr.bf16.mxu1 %v2565_v17 }
 0xc30   : > { %p2494_p3 = por %p2493_p2, %p2492_p1 }
 0xc32   : > { %2375 = vmatpush3.bf16.msra.mxu1 %v2374_v37  ;;  %p2495_p5 = pnand %p2494_p3, %p2488_p0 }
 0xc33   : > { %2376 = vmatprep.subr.bf16.mxu1 %v2565_v17 }
 0xc36   : > { %2378 = vmatpush3.bf16.msra.mxu1 %v2377_v40 }
 0xc37   : > { %2379 = vmatprep.subr.bf16.mxu1 %v2565_v17 }
 0xc3a   : > { %2381 = vmatpush3.bf16.msra.mxu1 %v2380_v43 }
 0xc3b   : > { %2382 = vmatprep.subr.bf16.mxu1 %v2565_v17 }
 0xc3e   : > { %2384 = vmatpush3.bf16.msra.mxu1 %v2383_v46 }
 0xc3f   : > { %2385 = vmatprep.subr.bf16.mxu1 %v2565_v17 }
 0xc42   : > { %2387 = vmatpush3.bf16.msra.mxu1 %v2386_v49 }
 0xc43   : > { %2388 = vmatprep.subr.bf16.mxu1 %v2565_v17 }
 0xc46   : > { %2390 = vmatpush3.bf16.msra.mxu1 %v2389_v53 }
 0xc47   : > { %2391 = vmatprep.subr.bf16.mxu1 %v2565_v17 }
 0xc4a   : > { %2393 = vmatpush3.bf16.msra.mxu1 %v2392_v56 }
 0xd00   : > { %v1796_v5 = vpop.f32.mrb[8].mxu1 }
 0xd01   : > { %v1800_v6 = vadd.f32 %v1796_v5, %v1560_v61  ;;  %v2305_v7 = vpop.f32.mrb[9].mxu1 }
 0xd03   : > { %v1801_v9 = vadd.f32 %v1800_v6, %v2734_v0  ;;  %v1840_v0 = vld [vmem:[%s3047_s14 + $0x8] sm:$0xff] }
 0xd04   : > { %v2365_v18 = vpack.c.bf16 %v1840_v0, %v1839_v16 }
 0xd05   : > { %v2892_v10 = vadd.f32 %v2157_v8, %v1801_v9 }
 0xd06   : > { %2366 = vmatpush3.bf16.msra.mxu0 %v2365_v18 }
 0xd07   : > { %v1812_v11 = vsel %vm617_vm0, %v2892_v10, 0.0  ;;  %2367 = vmatprep.subr.bf16.mxu0 %v2565_v17 }
 0xd08   : > { %1813 = vadd.xlane.f32.xlu1 %v1812_v11 }
 0xd0a   : > { %2369 = vmatpush3.bf16.msra.mxu0 %v2368_v22 }
 0xd95   : > { %v1814_v12 = vpop.xlane.xlu1 %1813 }
 0xd96   : > { %v1815_v13 = vmul.f32 0.03125, %v1814_v12 }
 0xd98   : > { %v1816_v14 = vsub.f32 %v2892_v10, %v1815_v13 }
 0xd9a   : > { %v1817_v21 = vmul.f32 %v1816_v14, %v1816_v14 }
 0xd9c   : > { %v1818_v15 = vsel %vm617_vm0, %v1817_v21, 0.0 }
 0xd9d   : > { %1819 = vadd.xlane.f32.xlu1 %v1818_v15 }
 0xe2a   : > { %v1820_v23 = vpop.xlane.xlu1 %1819 }
 0xe2b   : > { %v1821_v24 = vmul.f32 0.03125, %v1820_v23 }
 0xe2d   : > { %v1822_v25 = vadd.f32 1e-05, %v1821_v24 }
 0xe2f   : > { %2479 = vrsqrt.f32 %v1822_v25 }
 0xe39   : > { %v2480_v26 = vpop.eup %2479 }
 0xe3a   : > { %v1824_v28 = vmul.f32 %v2480_v26, %v1816_v14 }
 0xe3c   : > { %v1831_v30 = vmul.f32 %v2158_v27, %v1824_v28 }
 0xe3e   : > { %v1838_v31 = vadd.f32 %v2159_v29, %v1831_v30 }
 0xe40   : > { %2315 = vmatmul.mubr.msk.f32.vlgmr.msra.gmra.mrb[18].mxu0 %vm617_vm0, %v1838_v31 }
 0xf13   : > { %v1919_v58 = vpop.f32.mrb[18].mxu0 }
 0xf14   : > { %v1920_v59 = vadd.f32 %v2160_v57, %v1919_v58  ;;  %v2316_v60 = vpop.f32.mrb[19].mxu0 }
 0xf16   : > { %v2162_v17 = vmul.f32 -1.702, %v1920_v59 }
 0xf18   : > { %v1925_v61 = vmul.f32 1.442695, %v2162_v17 }
 0xf1a   : > { %2481 = vpow2.f32 %v1925_v61 }
 0xf24   : > { %v2482_v62 = vpop.eup %2481 }
 0xf25   : > { %v1927_v63 = vadd.f32 1.0, %v2482_v62 }
 0xf27   : > { %2483 = vrcp.f32 %v1927_v63 }
 0xf31   : > { %v2484_v1 = vpop.eup %2483 }
 0xf32   : > { %v1930_v2 = vmul.f32 %v2484_v1, %v1920_v59 }
 0xf34   : > { %2350 = vmatmul.mubr.f32.vlgmr.msra.gmra.mrb[10].mxu1 %v1930_v2 }
0x1007   : > { %v2013_v3 = vpop.f32.mrb[10].mxu1 }
0x1008   : > { %v2017_v4 = vadd.f32 %v2013_v3, %v2892_v10  ;;  %v2351_v5 = vpop.f32.mrb[11].mxu1 }
0x100a   : > { %v2025_v6 = vadd.f32 %v2163_v52, %v2017_v4 }
0x100c   : > { %2026 = vst.msk [vmem:[%s601_s23] sm:$0xff] %vm617_vm0, %v2025_v6 }
0x100d   : > { %2498 = shalt.err (!%p2495_p5)
}
0x100e   : > { %s2499_s3 = scalar_lea.hbm %s2985_s5, 128  ;;  %s2503_s23 = scalar_lea.hbm %s3082_s4, 256 }
0x100f   : > { %p2500_p6 = scmp.ne.s32.totalorder %s2985_s5, %s2499_s3  ;;  %p2504_p10 = scmp.lt.u32.totalorder %s2985_s5, %s3082_s4 }
0x1010   : > { %p2505_p11 = scmp.lt.u32.totalorder %s2503_s23, %s2499_s3  ;;  %p2507_p13 = scmp.lt.u32.totalorder %s2499_s3, %s2985_s5 }
0x1011   : > { %p2501_p7 = pnand %p2500_p6, %p2711_p4 }
0x1012   : > { %p2506_p12 = por %p2505_p11, %p2504_p10 }
0x1013   : > { %p2502_p9 = pneg %p2501_p7 }
0x1014   : > { %p2508_p0 = por %p2507_p13, %p2506_p12 }
0x1016   : > { %p2509_p1 = pnand %p2508_p0, %p2502_p9 }
0x1018   : > { %2512 = shalt.err (!%p2509_p1)
}
0x1019   : > { %2394 = dma.vmem_to_hbm [thread:$0]  (%p2711_p4), %s2987_s17, 128, %s2985_s5, %s2028_s2  }
0x101a PF: > { %s3083_s30 = sld [smem:[#allocation5_spill]]  ;;  %p2400_p2 = scmp.ge.s32.totalorder %s2563_s19, 2 }
0x101c   : > { %p2397_p3 = pnand %p2400_p2, %p2718_p8 }
0x1020   : > { %s2054_s26 = sand.u32 1, %s3083_s30  }
0x1021   : > { %s2055_s1 = scalar_lea.sflag [#allocation3], %s2054_s26 }
0x1022   : > { %2538 = dma.done.wait (!%p2397_p3), %s2055_s1, 128  }
0x1023   : > { %2540 = vsyncadd (!%p2397_p3), %s2055_s1, 4294967168  ;;  %s31_s19 = sadd.s32 1, %s2563_s19   ;;  %s3084_s30 = sld [smem:[#allocation6_spill]] }
0x1024   : > { %p28_p5 = scmp.ge.s32.totalorder %s31_s19, 4   ;;  %s3085_s0 = sld [smem:[#allocation7_spill]] }
0x1025   : > { %s3086_s27 = smov %s2547_s28  ;;  %s3087_s28 = smov %s2551_s29 }
0x1026   : > { %s3088_s29 = smov %s2724_s25  ;;  %30 = sbr.rel (!%p28_p5) target bundleno = 13 (0xd), region = 130 }
0x102d   :  { %2060 = vsyncpa [#allocation3], 1 }
0x102e   :  { %2062 = vsyncpa [#allocation3 + $0x1], 1 }

</bundles_post_ra>
